<compile_context>
chip_gen: v6e
topology: v6e:2x2x1
jax: 0.10.0
libtpu: 0.0.40
codegen_flags: <defaults>
</compile_context>

<pallas_src>
import functools

import jax
import jax.numpy as jnp
from jax import lax
from jax.experimental import pallas as pl
from jax.experimental.pallas import tpu as pltpu

LANE = 128


def _round_up(x, m):
    return -(-x // m) * m


# ---------------------------------------------------------------------------
# Fused Pallas kernel: conv3x3 (stride 1, pad 1) + ReLU + global-avg-pool + fc
# ---------------------------------------------------------------------------
def fused_backbone_kernel(x_ref, wconv_ref, wfc_ref, b_ref, o_ref,
                          *, H, W, Wq, kh, TM):
    """One batch-chunk of images per grid step.

    x_ref:     [B_blk, L, kw*Cin]   bf16 width-im2col'd, spatially padded images
                                    (L = (H + kh - 1) * Wq; Wq = row stride, multiple of 16)
    wconv_ref: [kh, kw*Cin, O_pad]  bf16 conv weight, one [kw*Cin, O_pad] slab per row tap
    wfc_ref:   [O_pad, E_pad]       bf16 fc weight (transposed), 128-lane padded
    b_ref:     [1, E_pad]           f32 fc bias
    o_ref:     [1, B_blk, E_pad]    f32 output embeddings
    """
    B_blk = x_ref.shape[0]
    O_pad = wconv_ref.shape[-1]
    M = H * Wq                       # conv-output rows per image (cols in [W, Wq) are all-zero)
    n_chunks = M // TM
    inv_hw = 1.0 / (H * W)

    # Resident operands / constants, hoisted out of all loops (JAX does not CSE broadcasts).
    wtaps = [wconv_ref[di] for di in range(kh)]          # kh x [kw*Cin, O_pad] bf16
    wfc = wfc_ref[...]                                   # [O_pad, E_pad] bf16
    bias = b_ref[...]                                    # [1, E_pad] f32
    ones_row = jnp.full((1, TM), 1.0, dtype=jnp.bfloat16)

    @pl.loop(0, B_blk)
    def _(b):
        def chunk_body(ci, pooled):
            # TM (<=128) output rows at a time: live tiles stay ~16 vregs, no spills,
            # and the [M, O_pad] f32 feature map never materializes in full.
            acc = None
            for di in range(kh):                         # kh sublane-aligned row taps
                start = pl.multiple_of(ci * TM + di * Wq, 16)
                xs = x_ref[b, pl.ds(start, TM), :]       # [TM, kw*Cin] bf16, aligned slice
                part = jnp.dot(xs, wtaps[di],
                               preferred_element_type=jnp.float32)
                acc = part if acc is None else acc + part
            feat = jnp.maximum(acc, 0.0)                 # ReLU, [TM, O_pad] f32
            # GAP partial sum as an MXU contraction (keeps the reduction off the XLU path).
            return pooled + jnp.dot(ones_row, feat.astype(jnp.bfloat16),
                                    preferred_element_type=jnp.float32)

        pooled = lax.fori_loop(0, n_chunks, chunk_body,
                               jnp.zeros((1, O_pad), jnp.float32),
                               unroll=n_chunks <= 8)
        pooled = pooled * inv_hw                         # mean, kept in f32

        # fc head (lane-dense, 128-padded): Linear + bias.
        row = jnp.dot(pooled.astype(jnp.bfloat16), wfc,
                      preferred_element_type=jnp.float32) + bias
        o_ref[0, pl.ds(b, 1), :] = row


# ---------------------------------------------------------------------------
# pallas_call wrapper
# ---------------------------------------------------------------------------
def fused_backbone(x_cols, wconv, wfc, bias, *, H, W, Wq, kh, n_steps, B_blk):
    N_pad, L, KC = x_cols.shape
    O_pad = wconv.shape[-1]
    E_pad = wfc.shape[1]
    M = H * Wq
    # Largest row-chunk <= 128 that divides M (M is always a multiple of 16).
    TM = next(t for t in (128, 64, 32, 16) if M % t == 0)

    kernel = functools.partial(fused_backbone_kernel,
                               H=H, W=W, Wq=Wq, kh=kh, TM=TM)

    return pl.pallas_call(
        kernel,
        out_shape=jax.ShapeDtypeStruct((n_steps, B_blk, E_pad), jnp.float32),
        grid_spec=pltpu.PrefetchScalarGridSpec(
            num_scalar_prefetch=0,
            grid=(n_steps,),
            in_specs=[
                pl.BlockSpec((B_blk, L, KC), lambda s: (s, 0, 0)),   # batch chunk of images
                pl.BlockSpec((kh, KC, O_pad), lambda s: (0, 0, 0)),  # resident conv weight
                pl.BlockSpec((O_pad, E_pad), lambda s: (0, 0)),      # resident fc weight
                pl.BlockSpec((1, E_pad), lambda s: (0, 0)),          # resident fc bias
                # (resident operands could use pipeline_mode=pl.Buffered(1); they are
                #  <100 KB double-buffered here so the default is kept for robustness)
            ],
            out_specs=pl.BlockSpec((1, B_blk, E_pad), lambda s: (s, 0, 0)),
        ),
        compiler_params=pltpu.CompilerParams(
            dimension_semantics=("parallel",),   # >=2 steps when N>=2 -> both v7x TCs + pipelining
        ),
    )(x_cols, wconv, wfc, bias)


# ---------------------------------------------------------------------------
# Parameter init (matches PyTorch defaults of the module)
# ---------------------------------------------------------------------------
def init_params(key, in_ch, conv_out, kh, kw, embedding_dim):
    k1, k2, k3 = jax.random.split(key, 3)
    # xavier_uniform_ for the modified conv1 weight (PyTorch shape [O, Cin, kh, kw]).
    fan_in = in_ch * kh * kw
    fan_out = conv_out * kh * kw
    bound = (6.0 / (fan_in + fan_out)) ** 0.5
    conv_w = jax.random.uniform(
        k1, (conv_out, in_ch, kh, kw), jnp.float32, -bound, bound)
    # nn.Linear default init: U(-1/sqrt(in_features), 1/sqrt(in_features)).
    fc_bound = 1.0 / (conv_out ** 0.5)
    fc_w = jax.random.uniform(
        k2, (embedding_dim, conv_out), jnp.float32, -fc_bound, fc_bound)
    fc_b = jax.random.uniform(
        k3, (embedding_dim,), jnp.float32, -fc_bound, fc_bound)
    return conv_w, fc_w, fc_b


# ---------------------------------------------------------------------------
# Full forward (NCHW in, [N, embedding_dim] out)
# ---------------------------------------------------------------------------
@functools.partial(jax.jit, static_argnames=("kh", "kw"))
def timm_backbone_forward(x_nchw, conv_w, fc_w, fc_b, kh=3, kw=3):
    N, Cin, H, W = x_nchw.shape
    O = conv_w.shape[0]
    E = fc_w.shape[0]
    pad_h, pad_w = kh // 2, kw // 2
    O_pad = _round_up(O, LANE)
    E_pad = _round_up(E, LANE)
    Wq = _round_up(W, 16)            # flattened row stride: mult of 16 -> bf16-pack-aligned taps
    Hp = H + 2 * pad_h
    KC = kw * Cin
    L = Hp * Wq
    M = H * Wq
    # Explicit in-bounds guarantee for the kernel's shifted row reads (no runtime VMEM checks):
    assert L >= (kh - 1) * Wq + M

    # NCHW -> NHWC, spatial zero-pad.
    x_nhwc = jnp.transpose(x_nchw, (0, 2, 3, 1))
    xp = jnp.pad(x_nhwc, ((0, 0), (pad_h, pad_h), (pad_w, pad_w), (0, 0)))
    # Width-im2col: fold the kw column taps into the channel axis (K: Cin -> kw*Cin).
    # The kh row taps stay in-kernel as sublane-aligned shifts of di*Wq.
    y = jnp.concatenate([xp[:, :, dj:dj + W, :] for dj in range(kw)], axis=-1)
    y = jnp.pad(y, ((0, 0), (0, 0), (0, Wq - W), (0, 0)))   # zero output-columns [W, Wq)
    x_cols = y.reshape(N, L, KC).astype(jnp.bfloat16)       # bf16 MXU operand, halves DMA bytes

    # Conv weight [O, Cin, kh, kw] -> [kh, kw*Cin, O_pad], matching x_cols channel order.
    wt = jnp.transpose(conv_w, (2, 3, 1, 0)).reshape(kh, KC, O)
    wconv = jnp.pad(wt, ((0, 0), (0, 0), (0, O_pad - O))).astype(jnp.bfloat16)

    # fc weight/bias, transposed, lane-dense 128-padded; MXU operands bf16, bias f32.
    wfc = jnp.pad(jnp.transpose(fc_w),
                  ((0, O_pad - O), (0, E_pad - E))).astype(jnp.bfloat16)
    bias = jnp.pad(fc_b, (0, E_pad - E)).reshape(1, E_pad).astype(jnp.float32)

    # Batch-chunk the grid: all images split over (at least) 2 "parallel" steps when N>=2
    # so both v7x TensorCores are used while per-step overhead is amortized over B_blk images.
    # B_blk is capped from a v7x-safe VMEM budget (x block is lane-padded to 128 in VMEM,
    # double-buffered), not from v5e/v6e's 128 MiB.
    bytes_per_img_vmem = L * LANE * 2                 # bf16, lane-padded footprint
    max_B = max(1, (8 * 1024 * 1024) // (2 * bytes_per_img_vmem))
    n_steps = max(2 if N >= 2 else 1, -(-N // max_B))
    B_blk = -(-N // n_steps)
    N_pad = n_steps * B_blk
    if N_pad != N:
        x_cols = jnp.pad(x_cols, ((0, N_pad - N), (0, 0), (0, 0)))

    out = fused_backbone(x_cols, wconv, wfc, bias, H=H, W=W, Wq=Wq, kh=kh,
                         n_steps=n_steps, B_blk=B_blk)
    return out.reshape(N_pad, E_pad)[:N, :E]


if __name__ == "__main__":
    # Small shapes consistent with the module: batch=2, modify_input_channels=4,
    # spatial=16x16, conv1 out channels=32, embedding_dim=64.
    N, Cin, H, W = 2, 4, 16, 16
    CONV_OUT, KH, KW = 32, 3, 3
    EMBED = 64

    key = jax.random.PRNGKey(0)
    k_x, k_p = jax.random.split(key)
    x = jax.random.normal(k_x, (N, Cin, H, W), jnp.float32)
    conv_w, fc_w, fc_b = init_params(k_p, Cin, CONV_OUT, KH, KW, EMBED)

    out = timm_backbone_forward(x, conv_w, fc_w, fc_b, kh=KH, kw=KW)
    out = jax.block_until_ready(out)
    assert out.shape == (N, EMBED), out.shape

    # Pure-JAX reference for the same simplified forward (conv -> relu -> GAP -> fc).
    x_nhwc = jnp.transpose(x, (0, 2, 3, 1))
    k_hwio = jnp.transpose(conv_w, (2, 3, 1, 0))
    ref = jax.lax.conv_general_dilated(
        x_nhwc, k_hwio, window_strides=(1, 1), padding="SAME",
        dimension_numbers=("NHWC", "HWIO", "NHWC"),
        precision=jax.lax.Precision.HIGHEST)
    ref = jnp.maximum(ref, 0.0).mean(axis=(1, 2))
    ref = jnp.dot(ref, fc_w.T, precision=jax.lax.Precision.HIGHEST) + fc_b
    # Kernel uses bf16 MXU operands with f32 accumulation; contractions are K<=256,
    # so the error stays well under this tolerance.
    err = float(jnp.max(jnp.abs(out - ref)))
    assert err < 1e-2, f"max abs err vs reference: {err}"

    print("KERNEL_OK")
</pallas_src>

<mosaic_0001>
module attributes {stable_mosaic.version = 11 : i64} {
  func.func @fused_backbone_kernel(%arg0: i32, %arg1: memref<1x288x12xbf16, #tpu.memory_space<vmem>>, %arg2: memref<3x12x128xbf16, #tpu.memory_space<vmem>>, %arg3: memref<128x128xbf16, #tpu.memory_space<vmem>>, %arg4: memref<1x128xf32, #tpu.memory_space<vmem>>, %arg5: memref<1x1x128xf32, #tpu.memory_space<vmem>>) attributes {dimension_semantics = [#tpu.dimension_semantics<parallel>], iteration_bounds = array<i64: 2>, scalar_prefetch = 0 : i64, scratch_operands = 0 : i64, tpu.core_type = #tpu.core_type<tc>, window_params = [{transform_indices = @transform_0, window_bounds = array<i64: 1, 288, 12>}, {pipeline_mode = #tpu.pipeline_mode<synchronous>, transform_indices = @transform_1, window_bounds = array<i64: 3, 12, 128>}, {pipeline_mode = #tpu.pipeline_mode<synchronous>, transform_indices = @transform_2, window_bounds = array<i64: 128, 128>}, {pipeline_mode = #tpu.pipeline_mode<synchronous>, transform_indices = @transform_3, window_bounds = array<i64: 1, 128>}, {transform_indices = @transform_4, window_bounds = array<i64: 1, 1, 128>}]} {
    %c0 = arith.constant 0 : index
    %c0_0 = arith.constant 0 : index
    %c0_1 = arith.constant 0 : index
    %0 = vector.load %arg2[%c0, %c0_0, %c0_1] : memref<3x12x128xbf16, #tpu.memory_space<vmem>>, vector<1x12x128xbf16>
    %1 = vector.shape_cast %0 : vector<1x12x128xbf16> to vector<12x128xbf16>
    %c1 = arith.constant 1 : index
    %c0_2 = arith.constant 0 : index
    %c0_3 = arith.constant 0 : index
    %2 = vector.load %arg2[%c1, %c0_2, %c0_3] : memref<3x12x128xbf16, #tpu.memory_space<vmem>>, vector<1x12x128xbf16>
    %3 = vector.shape_cast %2 : vector<1x12x128xbf16> to vector<12x128xbf16>
    %c2 = arith.constant 2 : index
    %c0_4 = arith.constant 0 : index
    %c0_5 = arith.constant 0 : index
    %4 = vector.load %arg2[%c2, %c0_4, %c0_5] : memref<3x12x128xbf16, #tpu.memory_space<vmem>>, vector<1x12x128xbf16>
    %5 = vector.shape_cast %4 : vector<1x12x128xbf16> to vector<12x128xbf16>
    %c0_6 = arith.constant 0 : index
    %c0_7 = arith.constant 0 : index
    %6 = vector.load %arg3[%c0_6, %c0_7] : memref<128x128xbf16, #tpu.memory_space<vmem>>, vector<128x128xbf16>
    %c0_8 = arith.constant 0 : index
    %c0_9 = arith.constant 0 : index
    %7 = vector.load %arg4[%c0_8, %c0_9] : memref<1x128xf32, #tpu.memory_space<vmem>>, vector<1x128xf32>
    %cst = arith.constant 1.000000e+00 : bf16
    %8 = vector.broadcast %cst : bf16 to vector<1x128xbf16>
    %c0_i32 = arith.constant 0 : i32
    %c1_i32 = arith.constant 1 : i32
    %9 = arith.muli %c0_i32, %c1_i32 : i32
    %c0_i32_10 = arith.constant 0 : i32
    %10 = arith.addi %c0_i32_10, %9 : i32
    %cst_11 = arith.constant 0.000000e+00 : f32
    %11 = vector.broadcast %cst_11 : f32 to vector<1x128xf32>
    %c0_i32_12 = arith.constant 0 : i32
    %c128_i32 = arith.constant 128 : i32
    %12 = arith.muli %c0_i32_12, %c128_i32 : i32
    %c0_i32_13 = arith.constant 0 : i32
    %13 = arith.addi %12, %c0_i32_13 : i32
    %14 = tpu.assume_multiple %13, 16 : i32
    %15 = arith.index_cast %10 : i32 to index
    %16 = arith.index_cast %14 : i32 to index
    %c0_14 = arith.constant 0 : index
    %17 = vector.load %arg1[%15, %16, %c0_14] : memref<1x288x12xbf16, #tpu.memory_space<vmem>>, vector<1x128x12xbf16>
    %18 = vector.shape_cast %17 : vector<1x128x12xbf16> to vector<128x12xbf16>
    %cst_15 = arith.constant dense<0.000000e+00> : vector<128x128xf32>
    %19 = tpu.matmul %18, %1, %cst_15 {dimension_numbers = #tpu.dot_dimension_numbers<[1], [0], [0], [1], [0, 0, 1, 1], [], []>} : vector<128x12xbf16>, vector<12x128xbf16>, vector<128x128xf32> -> vector<128x128xf32>
    %c128_i32_16 = arith.constant 128 : i32
    %20 = arith.muli %c0_i32_12, %c128_i32_16 : i32
    %c16_i32 = arith.constant 16 : i32
    %21 = arith.addi %20, %c16_i32 : i32
    %22 = tpu.assume_multiple %21, 16 : i32
    %23 = arith.index_cast %10 : i32 to index
    %24 = arith.index_cast %22 : i32 to index
    %c0_17 = arith.constant 0 : index
    %25 = vector.load %arg1[%23, %24, %c0_17] : memref<1x288x12xbf16, #tpu.memory_space<vmem>>, vector<1x128x12xbf16>
    %26 = vector.shape_cast %25 : vector<1x128x12xbf16> to vector<128x12xbf16>
    %cst_18 = arith.constant dense<0.000000e+00> : vector<128x128xf32>
    %27 = tpu.matmul %26, %3, %cst_18 {dimension_numbers = #tpu.dot_dimension_numbers<[1], [0], [0], [1], [0, 0, 1, 1], [], []>} : vector<128x12xbf16>, vector<12x128xbf16>, vector<128x128xf32> -> vector<128x128xf32>
    %28 = arith.addf %19, %27 : vector<128x128xf32>
    %c128_i32_19 = arith.constant 128 : i32
    %29 = arith.muli %c0_i32_12, %c128_i32_19 : i32
    %c32_i32 = arith.constant 32 : i32
    %30 = arith.addi %29, %c32_i32 : i32
    %31 = tpu.assume_multiple %30, 16 : i32
    %32 = arith.index_cast %10 : i32 to index
    %33 = arith.index_cast %31 : i32 to index
    %c0_20 = arith.constant 0 : index
    %34 = vector.load %arg1[%32, %33, %c0_20] : memref<1x288x12xbf16, #tpu.memory_space<vmem>>, vector<1x128x12xbf16>
    %35 = vector.shape_cast %34 : vector<1x128x12xbf16> to vector<128x12xbf16>
    %cst_21 = arith.constant dense<0.000000e+00> : vector<128x128xf32>
    %36 = tpu.matmul %35, %5, %cst_21 {dimension_numbers = #tpu.dot_dimension_numbers<[1], [0], [0], [1], [0, 0, 1, 1], [], []>} : vector<128x12xbf16>, vector<12x128xbf16>, vector<128x128xf32> -> vector<128x128xf32>
    %37 = arith.addf %28, %36 : vector<128x128xf32>
    %cst_22 = arith.constant 0.000000e+00 : f32
    %38 = vector.broadcast %cst_22 : f32 to vector<128x128xf32>
    %39 = arith.maximumf %37, %38 : vector<128x128xf32>
    %40 = arith.truncf %39 : vector<128x128xf32> to vector<128x128xbf16>
    %cst_23 = arith.constant dense<0.000000e+00> : vector<1x128xf32>
    %41 = tpu.matmul %8, %40, %cst_23 {dimension_numbers = #tpu.dot_dimension_numbers<[1], [0], [0], [1], [0, 0, 1, 1], [], []>} : vector<1x128xbf16>, vector<128x128xbf16>, vector<1x128xf32> -> vector<1x128xf32>
    %42 = arith.addf %11, %41 : vector<1x128xf32>
    %c1_i32_24 = arith.constant 1 : i32
    %c128_i32_25 = arith.constant 128 : i32
    %43 = arith.muli %c1_i32_24, %c128_i32_25 : i32
    %c0_i32_26 = arith.constant 0 : i32
    %44 = arith.addi %43, %c0_i32_26 : i32
    %45 = tpu.assume_multiple %44, 16 : i32
    %46 = arith.index_cast %10 : i32 to index
    %47 = arith.index_cast %45 : i32 to index
    %c0_27 = arith.constant 0 : index
    %48 = vector.load %arg1[%46, %47, %c0_27] : memref<1x288x12xbf16, #tpu.memory_space<vmem>>, vector<1x128x12xbf16>
    %49 = vector.shape_cast %48 : vector<1x128x12xbf16> to vector<128x12xbf16>
    %cst_28 = arith.constant dense<0.000000e+00> : vector<128x128xf32>
    %50 = tpu.matmul %49, %1, %cst_28 {dimension_numbers = #tpu.dot_dimension_numbers<[1], [0], [0], [1], [0, 0, 1, 1], [], []>} : vector<128x12xbf16>, vector<12x128xbf16>, vector<128x128xf32> -> vector<128x128xf32>
    %c128_i32_29 = arith.constant 128 : i32
    %51 = arith.muli %c1_i32_24, %c128_i32_29 : i32
    %c16_i32_30 = arith.constant 16 : i32
    %52 = arith.addi %51, %c16_i32_30 : i32
    %53 = tpu.assume_multiple %52, 16 : i32
    %54 = arith.index_cast %10 : i32 to index
    %55 = arith.index_cast %53 : i32 to index
    %c0_31 = arith.constant 0 : index
    %56 = vector.load %arg1[%54, %55, %c0_31] : memref<1x288x12xbf16, #tpu.memory_space<vmem>>, vector<1x128x12xbf16>
    %57 = vector.shape_cast %56 : vector<1x128x12xbf16> to vector<128x12xbf16>
    %cst_32 = arith.constant dense<0.000000e+00> : vector<128x128xf32>
    %58 = tpu.matmul %57, %3, %cst_32 {dimension_numbers = #tpu.dot_dimension_numbers<[1], [0], [0], [1], [0, 0, 1, 1], [], []>} : vector<128x12xbf16>, vector<12x128xbf16>, vector<128x128xf32> -> vector<128x128xf32>
    %59 = arith.addf %50, %58 : vector<128x128xf32>
    %c128_i32_33 = arith.constant 128 : i32
    %60 = arith.muli %c1_i32_24, %c128_i32_33 : i32
    %c32_i32_34 = arith.constant 32 : i32
    %61 = arith.addi %60, %c32_i32_34 : i32
    %62 = tpu.assume_multiple %61, 16 : i32
    %63 = arith.index_cast %10 : i32 to index
    %64 = arith.index_cast %62 : i32 to index
    %c0_35 = arith.constant 0 : index
    %65 = vector.load %arg1[%63, %64, %c0_35] : memref<1x288x12xbf16, #tpu.memory_space<vmem>>, vector<1x128x12xbf16>
    %66 = vector.shape_cast %65 : vector<1x128x12xbf16> to vector<128x12xbf16>
    %cst_36 = arith.constant dense<0.000000e+00> : vector<128x128xf32>
    %67 = tpu.matmul %66, %5, %cst_36 {dimension_numbers = #tpu.dot_dimension_numbers<[1], [0], [0], [1], [0, 0, 1, 1], [], []>} : vector<128x12xbf16>, vector<12x128xbf16>, vector<128x128xf32> -> vector<128x128xf32>
    %68 = arith.addf %59, %67 : vector<128x128xf32>
    %cst_37 = arith.constant 0.000000e+00 : f32
    %69 = vector.broadcast %cst_37 : f32 to vector<128x128xf32>
    %70 = arith.maximumf %68, %69 : vector<128x128xf32>
    %71 = arith.truncf %70 : vector<128x128xf32> to vector<128x128xbf16>
    %cst_38 = arith.constant dense<0.000000e+00> : vector<1x128xf32>
    %72 = tpu.matmul %8, %71, %cst_38 {dimension_numbers = #tpu.dot_dimension_numbers<[1], [0], [0], [1], [0, 0, 1, 1], [], []>} : vector<1x128xbf16>, vector<128x128xbf16>, vector<1x128xf32> -> vector<1x128xf32>
    %73 = arith.addf %42, %72 : vector<1x128xf32>
    %c2_i32 = arith.constant 2 : i32
    %cst_39 = arith.constant 3.906250e-03 : f32
    %74 = vector.broadcast %cst_39 : f32 to vector<1x128xf32>
    %75 = arith.mulf %73, %74 : vector<1x128xf32>
    %76 = arith.truncf %75 : vector<1x128xf32> to vector<1x128xbf16>
    %cst_40 = arith.constant dense<0.000000e+00> : vector<1x128xf32>
    %77 = tpu.matmul %76, %6, %cst_40 {dimension_numbers = #tpu.dot_dimension_numbers<[1], [0], [0], [1], [0, 0, 1, 1], [], []>} : vector<1x128xbf16>, vector<128x128xbf16>, vector<1x128xf32> -> vector<1x128xf32>
    %78 = arith.addf %77, %7 : vector<1x128xf32>
    %c0_41 = arith.constant 0 : index
    %79 = arith.index_cast %10 : i32 to index
    %c0_42 = arith.constant 0 : index
    %80 = vector.load %arg5[%c0_41, %79, %c0_42] : memref<1x1x128xf32, #tpu.memory_space<vmem>>, vector<1x1x128xf32>
    %81 = vector.shape_cast %80 : vector<1x1x128xf32> to vector<1x128xf32>
    %82 = vector.shape_cast %78 : vector<1x128xf32> to vector<1x1x128xf32>
    tpu.vector_store %arg5[%c0_41, %79, %c0_42], %82 {strides = array<i32>} : memref<1x1x128xf32, #tpu.memory_space<vmem>>, vector<1x1x128xf32>,
    %c1_i32_43 = arith.constant 1 : i32
    return
  }
  func.func @transform_0(%arg0: i32) -> (i32, i32, i32) {
    %c0_i32 = arith.constant 0 : i32
    %c0_i32_0 = arith.constant 0 : i32
    %c0_i32_1 = arith.constant 0 : i32
    return %arg0, %c0_i32, %c0_i32_0 : i32, i32, i32
  }
  func.func @transform_1(%arg0: i32) -> (i32, i32, i32) {
    %c0_i32 = arith.constant 0 : i32
    %c0_i32_0 = arith.constant 0 : i32
    %c0_i32_1 = arith.constant 0 : i32
    %c0_i32_2 = arith.constant 0 : i32
    return %c0_i32, %c0_i32_0, %c0_i32_1 : i32, i32, i32
  }
  func.func @transform_2(%arg0: i32) -> (i32, i32) {
    %c0_i32 = arith.constant 0 : i32
    %c0_i32_0 = arith.constant 0 : i32
    %c0_i32_1 = arith.constant 0 : i32
    return %c0_i32, %c0_i32_0 : i32, i32
  }
  func.func @transform_3(%arg0: i32) -> (i32, i32) {
    %c0_i32 = arith.constant 0 : i32
    %c0_i32_0 = arith.constant 0 : i32
    %c0_i32_1 = arith.constant 0 : i32
    return %c0_i32, %c0_i32_0 : i32, i32
  }
  func.func @transform_4(%arg0: i32) -> (i32, i32, i32) {
    %c0_i32 = arith.constant 0 : i32
    %c0_i32_0 = arith.constant 0 : i32
    %c0_i32_1 = arith.constant 0 : i32
    return %arg0, %c0_i32, %c0_i32_0 : i32, i32, i32
  }
}

</mosaic_0001>

<bundles_post_ra>
// kernel: timm_backbone_forward.1
= control target key start
LH: loop header
LB: loop body
LE: loop exit
PB: predicated region body
PF: predicated region fallthrough
CT: control target
= control target key end

     0   :  { %9 = vsyncpa [#allocation3], 0  ;;  %s2677_s0 = inlined_call_operand.vmem [shape: bf16[2,288,12], index: 0, kind: input, shape index: {}]   ;;  %s2678_s1 = inlined_call_operand.vmem [shape: bf16[3,12,128], index: 1, kind: input, shape index: {}]   ;;  %s2679_s2 = inlined_call_operand.vmem [shape: bf16[128,128], index: 2, kind: input, shape index: {}]   ;;  %s2680_s3 = inlined_call_operand.vmem [shape: f32[1,128], index: 3, kind: input, shape index: {}]   ;;  %s2681_s4 = inlined_call_operand.hbm [shape: f32[2,1,128], index: 4, kind: output, shape index: {}]  }
   0x1   :  { %11 = vsyncpa [#allocation3 + $0x1], 0  ;;  %s2284_s15 = smov 0   ;;  %s2286_s16 = smov 0  }
   0x2   :  { %s2288_s17 = smov 0   ;;  %s2290_s18 = smov 0  }
   0x3 LB: > { %s2305_s19 = sadd.s32 4294967295, %s2253_s18   ;;  %s1634_s20 = sadd.s32 4294967294, %s2253_s18   ;;  %s2253_s18 = sphi %s2290_s18, %s2687_s18   ;;  %s2249_s17 = sphi %s2288_s17, %s2686_s17   ;;  %s2245_s16 = sphi %s2286_s16, %s2685_s16   ;;  %s2241_s15 = sphi %s2284_s15, %s2684_s15  }
   0x4   : > { %s2309_s21 = sadd.s32 1, %s2253_s18   ;;  %s113_s22 = sadd.s32 1, %s2249_s17 }
   0x5   : > { %s110_s23 = ssub.s32 %s2253_s18, %s2309_s21  ;;  %p123_p0 = scmp.ne.s32.totalorder %s2249_s17, %s2245_s16 }
   0x6   : > { %p111_p1 = scmp.eq.s32.totalorder %s110_s23, 0  ;;  %p124_p2 = scmp.eq.s32.totalorder %s2305_s19, 1 }
   0x7   : > { %p129_p3 = scmp.ne.s32.totalorder %s2245_s16, %s2241_s15  ;;  %p130_p4 = scmp.eq.s32.totalorder %s1634_s20, 1 }
   0x8   : > { %s2320_s24 = scalar_select %p111_p1, %s2249_s17, %s113_s22  }
   0x9   : > { %p2322_p5 = por %p124_p2, %p123_p0  ;;  %p2326_p6 = por %p130_p4, %p129_p3 }
   0xa   : > { %p1637_p7 = scmp.ge.s32.totalorder %s2253_s18, 1  ;;  %p165_p8 = scmp.lt.s32.totalorder %s2253_s18, 3 }
   0xc   : > { %p166_p9 = pnand %p1637_p7, %p165_p8 }
   0xd   : > { %p190_p10 = scmp.lt.s32.totalorder (!%p166_p9), %s2305_s19, 1  ;;  %s1830_s14 = sshll.u32 (!%p166_p9), %s2305_s19, 4 }
   0xe   : > { %169 = sbr.rel (%p166_p9) target bundleno = 773 (0x305), region = 36  ;;  %s2636_s28 = scalar_lea.hbm (!%p166_p9), %s2681_s4, %s1830_s14 }
  0x13   : > { %v2134_v0 = vld [vmem:[%s2678_s1 + $0x8] sm:$0x3f]   ;;  %vm325_vm0 = vcmask 1045504   ;;  %v2139_v2 = vld [vmem:[%s2678_s1] sm:$0x3f]   ;;  %s191_s5 = scalar_select %p190_p10, %s2305_s19, 1 }
  0x14   : > { %2084 = vmatprep.subr.msk.bf16.mxu0 %vm325_vm0, %v2134_v0  ;;  %2085 = vmatprep.subr.msk.bf16.mxu1 %vm325_vm0, %v2134_v0  ;;  %v327_v1 = vsel %vm325_vm0, %v2134_v0, 0  ;;  %v2144_v3 = vld [vmem:[%s2678_s1 + $0x10] sm:$0x3f]   ;;  %vm300_vm1 = vcmask 97280   ;;  %v496_v9 = vsel %vm325_vm0, %v2139_v2, 0  ;;  %v2255_v54 = vmov 0.0  }
  0x15   : > { %1915 = vmatpush3.bf16.msra.mxu0 %v327_v1  ;;  %2083 = vmatpush3.bf16.msra.mxu1 %v327_v1  ;;  %s2091_s8 = smul.u32 144, %s191_s5  ;;  %v2358_v7 = vsel %vm325_vm0, %v2144_v3, 0  ;;  %vm2256_vm2 = vmmov 0   ;;  %s2258_s19 = smov [#allocation2]  }
  0x16   : > { %2086 = vmatprep.subr.msk.bf16.mxu1 %vm325_vm0, %v2139_v2  ;;  %2087 = vmatprep.subr.msk.bf16.mxu0 %vm325_vm0, %v2144_v3  ;;  %s2197_s5 = sshll.u32 %s2258_s19, 4  ;;  %s2198_s5 = int_to_ptr.vmem [resolvable:$false] %s2197_s5 }
  0x17   : > { %s2351_s11 = scalar_lea.vmem %s2677_s0, %s2091_s8  ;;  %s2199_s6 = scalar_lea.vmem %s2198_s5, 32 }
  0x18   : > { %v2135_v4 = vld [vmem:[%s2351_s11 + $0x8] sm:$0xff]   ;;  %v2137_v6 = vld [vmem:[%s2351_s11 + $0x10] sm:$0xff]   ;;  %v2140_v10 = vld [vmem:[%s2351_s11 + $0x18] sm:$0xff]  }
  0x19   : > { %v2136_v5 = vld [vmem:[%s2351_s11 + $0x28] sm:$0xff]   ;;  %1916 = vmatprep.mubr.msk.bf16.mxu0 %vm300_vm1, %v2135_v4  ;;  %v2138_v8 = vld [vmem:[%s2351_s11 + $0x30] sm:$0xff]   ;;  %v2141_v11 = vld [vmem:[%s2351_s11 + $0x38] sm:$0xff]  }
  0x1a   : > { %1924 = vmatprep.mubr.msk.bf16.mxu1 %vm300_vm1, %v2136_v5  ;;  %1917 = vmatmul.mubr.msk.bf16.vlgmr.msra.gmra.mxu0 %vm300_vm1, %v2137_v6  ;;  %v2142_v12 = vld [vmem:[%s2351_s11 + $0x20] sm:$0xff]   ;;  %v2146_v14 = vld [vmem:[%s2351_s11 + $0x10] sm:$0xff]   ;;  %v2147_v16 = vld [vmem:[%s2351_s11 + $0x8] sm:$0xff]  }
  0x1b   : > { %1925 = vmatmul.mubr.msk.bf16.vlgmr.msra.gmra.mxu1 %vm300_vm1, %v2138_v8  ;;  %1951 = vmatpush3.bf16.msra.mxu0 %v2358_v7  ;;  %v2143_v13 = vld [vmem:[%s2351_s11 + $0x40] sm:$0xff]   ;;  %v2148_v17 = vld [vmem:[%s2351_s11 + $0x18] sm:$0xff]   ;;  %v2149_v19 = vld [vmem:[%s2351_s11 + $0x10] sm:$0xff]  }
  0x1c   : > { %1933 = vmatpush3.bf16.msra.mxu1 %v496_v9  ;;  %1920 = vmatprep.mubr.msk.bf16.mxu0 %vm300_vm1, %v2140_v10  ;;  %v2145_v15 = vld [vmem:[%s2351_s11] sm:$0xff]   ;;  %v2151_v20 = vld [vmem:[%s2351_s11 + $0x18] sm:$0xff]   ;;  %v2152_v21 = vld [vmem:[%s2351_s11 + $0x28] sm:$0xff]  }
  0x1d   : > { %1928 = vmatprep.mubr.msk.bf16.mxu1 %vm300_vm1, %v2141_v11  ;;  %2088 = vmatprep.subr.msk.bf16.mxu1 %vm325_vm0, %v2134_v0  ;;  %v2150_v18 = vld [vmem:[%s2351_s11 + $0x20] sm:$0xff]   ;;  %v2154_v22 = vld [vmem:[%s2351_s11 + $0x30] sm:$0xff]   ;;  %v2155_v24 = vld [vmem:[%s2351_s11 + $0x28] sm:$0xff]  }
  0x1e   : > { %2089 = vmatprep.subr.msk.bf16.mxu0 %vm325_vm0, %v2139_v2  ;;  %v2153_v23 = vld [vmem:[%s2351_s11 + $0x20] sm:$0xff]   ;;  %v2156_v25 = vld [vmem:[%s2351_s11 + $0x38] sm:$0xff]   ;;  %v2157_v27 = vld [vmem:[%s2351_s11 + $0x30] sm:$0xff]  }
  0x1f   : > { %v2158_v26 = vld [vmem:[%s2351_s11 + $0x40] sm:$0xff]   ;;  %v2159_v28 = vld [vmem:[%s2351_s11 + $0x38] sm:$0xff]   ;;  %v2160_v29 = vld [vmem:[%s2351_s11 + $0x48] sm:$0xff]  }
  0x20   : > { %v2162_v30 = vld [vmem:[%s2351_s11 + $0x40] sm:$0xff]   ;;  %v2161_v31 = vld [vmem:[%s2351_s11 + $0x48] sm:$0xff]   ;;  %v2163_v33 = vld [vmem:[%s2351_s11 + $0x50] sm:$0xff]  }
  0x21   : > { %v2164_v32 = vld [vmem:[%s2351_s11 + $0x48] sm:$0xff]   ;;  %v2166_v34 = vld [vmem:[%s2351_s11 + $0x50] sm:$0xff]   ;;  %v2165_v35 = vld [vmem:[%s2351_s11 + $0x58] sm:$0xff]  }
  0x22   : > { %1921 = vmatmul.mubr.msk.bf16.gmra.mxu0 %vm300_vm1, %v2142_v12  ;;  %v2168_v36 = vld [vmem:[%s2351_s11 + $0x58] sm:$0xff]   ;;  %v2167_v37 = vld [vmem:[%s2351_s11 + $0x60] sm:$0xff]   ;;  %v2169_v39 = vld [vmem:[%s2351_s11 + $0x68] sm:$0xff]  }
  0x23   : > { %1929 = vmatmul.mubr.msk.bf16.gmra.mxu1 %vm300_vm1, %v2143_v13  ;;  %1952 = vmatprep.mubr.msk.bf16.mxu0 %vm300_vm1, %v2146_v14  ;;  %v2170_v38 = vld [vmem:[%s2351_s11 + $0x60] sm:$0xff]   ;;  %v2172_v40 = vld [vmem:[%s2351_s11 + $0x68] sm:$0xff]   ;;  %v2171_v41 = vld [vmem:[%s2351_s11 + $0x70] sm:$0xff]  }
  0x24   : > { %1934 = vmatprep.mubr.msk.bf16.mxu1 %vm300_vm1, %v2145_v15  ;;  %v2174_v42 = vld [vmem:[%s2351_s11 + $0x70] sm:$0xff]   ;;  %v2173_v43 = vld [vmem:[%s2351_s11 + $0x78] sm:$0xff]   ;;  %v2175_v45 = vld [vmem:[%s2351_s11 + $0x80] sm:$0xff]  }
  0x25   : > { %v2176_v44 = vld [vmem:[%s2351_s11 + $0x78] sm:$0xff]   ;;  %v2177_v46 = vld [vmem:[%s2351_s11 + $0x50] sm:$0xff]   ;;  %v2179_v48 = vld [vmem:[%s2351_s11 + $0x60] sm:$0xff]  }
  0x26   : > { %v2178_v47 = vld [vmem:[%s2351_s11 + $0x58] sm:$0xff]   ;;  %v2180_v49 = vld [vmem:[%s2351_s11 + $0x68] sm:$0xff]   ;;  %v2181_v50 = vld [vmem:[%s2351_s11 + $0x70] sm:$0xff]  }
  0x27   : > { %v2182_v51 = vld [vmem:[%s2351_s11 + $0x78] sm:$0xff]   ;;  %v2183_v52 = vld [vmem:[%s2351_s11 + $0x80] sm:$0xff]   ;;  %v2184_v53 = vld [vmem:[%s2351_s11 + $0x88] sm:$0xff]   ;;  %s188_s11 = sand.u32 1, %s2245_s16  }
  0x28   : > { %s189_s20 = scalar_lea.vmem [#allocation2], %s188_s11  ;;  %s1567_s29 = scalar_lea.sflag [#allocation3], %s188_s11 }
  0x29   : > { %s1579_s22 = sshll.u32 %s189_s20, 4  ;;  %s2638_s22 = int_to_ptr.vmem [resolvable:$true] %s1579_s22 }
  0x2a   : > { %1953 = vmatmul.mubr.msk.bf16.vlgmr.msra.gmra.mxu0 %vm300_vm1, %v2148_v17  ;;  %s2193_s30 = scalar_lea.vmem %s2638_s22, 16  ;;  %p2200_p0 = scmp.lt.s32.totalorder %s2638_s22, %s2198_s5 }
  0x2b   : > { %1935 = vmatmul.mubr.msk.bf16.vlgmr.msra.gmra.mxu1 %vm300_vm1, %v2147_v16  ;;  %1956 = vmatprep.mubr.msk.bf16.mxu0 %vm300_vm1, %v2150_v18  ;;  %p2194_p11 = scmp.ne.s32.totalorder %s2638_s22, %s2193_s30  ;;  %p2201_p1 = scmp.lt.s32.totalorder %s2199_s6, %s2193_s30 }
  0x2c   : > { %1969 = vmatpush3.bf16.msra.mxu1 %v327_v1  ;;  %1938 = vmatprep.mubr.msk.bf16.mxu1 %vm300_vm1, %v2149_v19 }
  0x2d   : > { %1987 = vmatpush3.bf16.msra.mxu0 %v496_v9  ;;  %2090 = vmatprep.subr.msk.bf16.mxu1 %vm325_vm0, %v2144_v3  ;;  %p2195_p12 = pnand %p2194_p11, %p2322_p5  ;;  %p2202_p2 = por %p2201_p1, %p2200_p0 }
  0x2e   : > { %2022 = vmatprep.subr.bf16.mxu0 %v2255_v54 }
  0x2f   : > { %p2196_p13 = pneg %p2195_p12 }
  0x31   : > { %p2203_p3 = pnand %p2202_p2, %p2196_p13 }
  0x32   : > { %1957 = vmatmul.mubr.msk.bf16.gmra.mxu0 %vm300_vm1, %v2152_v21 }
  0x33   : > { %1939 = vmatmul.mubr.msk.bf16.gmra.mxu1 %vm300_vm1, %v2151_v20  ;;  %1960 = vmatprep.mubr.msk.bf16.mxu0 %vm300_vm1, %v2154_v22 }
  0x34   : > { %1942 = vmatprep.mubr.msk.bf16.mxu1 %vm300_vm1, %v2153_v23 }
  0x3a   : > { %1961 = vmatmul.mubr.msk.bf16.gmra.mxu0 %vm300_vm1, %v2156_v25 }
  0x3b   : > { %1943 = vmatmul.mubr.msk.bf16.gmra.mxu1 %vm300_vm1, %v2155_v24  ;;  %1964 = vmatprep.mubr.msk.bf16.mxu0 %vm300_vm1, %v2158_v26 }
  0x3c   : > { %1946 = vmatprep.mubr.msk.bf16.mxu1 %vm300_vm1, %v2157_v27 }
  0x42   : > { %1965 = vmatmul.mubr.msk.bf16.gmra.mxu0 %vm300_vm1, %v2160_v29 }
  0x43   : > { %1947 = vmatmul.mubr.msk.bf16.gmra.mxu1 %vm300_vm1, %v2159_v28  ;;  %1988 = vmatprep.mubr.msk.bf16.mxu0 %vm300_vm1, %v2162_v30 }
  0x44   : > { %1970 = vmatprep.mubr.msk.bf16.mxu1 %vm300_vm1, %v2161_v31 }
  0x4a   : > { %1989 = vmatmul.mubr.msk.bf16.vlgmr.msra.gmra.mxu0 %vm300_vm1, %v2164_v32 }
  0x4b   : > { %1971 = vmatmul.mubr.msk.bf16.vlgmr.msra.gmra.mxu1 %vm300_vm1, %v2163_v33  ;;  %1992 = vmatprep.mubr.msk.bf16.mxu0 %vm300_vm1, %v2166_v34 }
  0x4c   : > { %2005 = vmatpush3.bf16.msra.mxu1 %v2358_v7  ;;  %1974 = vmatprep.mubr.msk.bf16.mxu1 %vm300_vm1, %v2165_v35 }
  0x4d   : > { %2042 = vmatprep.subr.bf16.mxu1 %v2255_v54 }
  0x52   : > { %1993 = vmatmul.mubr.msk.bf16.gmra.mxu0 %vm300_vm1, %v2168_v36 }
  0x53   : > { %1975 = vmatmul.mubr.msk.bf16.gmra.mxu1 %vm300_vm1, %v2167_v37  ;;  %1996 = vmatprep.mubr.msk.bf16.mxu0 %vm300_vm1, %v2170_v38 }
  0x54   : > { %1978 = vmatprep.mubr.msk.bf16.mxu1 %vm300_vm1, %v2169_v39 }
  0x5a   : > { %1997 = vmatmul.mubr.msk.bf16.gmra.mxu0 %vm300_vm1, %v2172_v40 }
  0x5b   : > { %1979 = vmatmul.mubr.msk.bf16.gmra.mxu1 %vm300_vm1, %v2171_v41  ;;  %2000 = vmatprep.mubr.msk.bf16.mxu0 %vm300_vm1, %v2174_v42 }
  0x5c   : > { %1982 = vmatprep.mubr.msk.bf16.mxu1 %vm300_vm1, %v2173_v43 }
  0x62   : > { %2001 = vmatmul.mubr.msk.bf16.gmra.mxu0 %vm300_vm1, %v2176_v44 }
  0x63   : > { %1983 = vmatmul.mubr.msk.bf16.gmra.mxu1 %vm300_vm1, %v2175_v45  ;;  %2038 = vmatprep.mubr.msk.bf16.mxu0 %vm2256_vm2, %v2255_v54 }
  0x64   : > { %2006 = vmatprep.mubr.msk.bf16.mxu1 %vm300_vm1, %v2177_v46 }
  0x6b   : > { %2007 = vmatmul.mubr.msk.bf16.vlgmr.msra.gmra.mxu1 %vm300_vm1, %v2178_v47 }
  0x6c   : > { %2010 = vmatprep.mubr.msk.bf16.mxu1 %vm300_vm1, %v2179_v48 }
  0x73   : > { %2011 = vmatmul.mubr.msk.bf16.gmra.mxu1 %vm300_vm1, %v2180_v49 }
  0x74   : > { %2014 = vmatprep.mubr.msk.bf16.mxu1 %vm300_vm1, %v2181_v50 }
  0x7b   : > { %2015 = vmatmul.mubr.msk.bf16.gmra.mxu1 %vm300_vm1, %v2182_v51 }
  0x7c   : > { %2018 = vmatprep.mubr.msk.bf16.mxu1 %vm300_vm1, %v2183_v52 }
  0x83   : > { %2019 = vmatmul.mubr.msk.bf16.gmra.mxu1 %vm300_vm1, %v2184_v53 }
  0x84   : > { %2058 = vmatprep.mubr.msk.bf16.mxu1 %vm2256_vm2, %v2255_v54 }
  0xda   : > { %v2460_v55 = vpop.f32.mrf.mxu0 }
  0xdb   : > { %v2462_v56 = vpop.f32.mrf.mxu1 }
  0xdc   : > { %v363_v57 = vpop.f32.mrf.mxu0 }
  0xdd   : > { %v2464_v58 = vpop.f32.mrf.mxu1 }
  0xde   : > { %v2466_v59 = vpop.f32.mrf.mxu0 }
  0xdf   : > { %v1927_v60 = vpop.f32.mrf.mxu1 }
  0xe0   : > { %v366_v61 = vpop.f32.mrf.mxu0 }
  0xe1   : > { %v2468_v62 = vpop.f32.mrf.mxu1 }
  0xe2   : > { %v2470_v63 = vpop.f32.mrf.mxu0 }
  0xe3   : > { %v1930_v0 = vpop.f32.mrf.mxu1 }
  0xe4   : > { %v2472_v1 = vpop.f32.mrf.mxu0 }
  0xe5   : > { %v411_v2 = vpop.f32.mrf.mxu1 }
  0xe6   : > { %v2474_v3 = vpop.f32.mrf.mxu0 }
  0xe7   : > { %v1931_v4 = vpop.f32.mrf.mxu1 }
  0xe8   : > { %v2480_v5 = vpop.f32.mrf.mxu0 }
  0xe9   : > { %v414_v6 = vpop.f32.mrf.mxu1 }
  0xea   : > { %v2482_v7 = vpop.f32.mrf.mxu0 }
  0xeb   : > { %v2484_v8 = vpop.f32.mrf.mxu1 }
  0xec   : > { %v718_v9 = vpop.f32.mrf.mxu0 }
  0xed   : > { %v532_v10 = vpop.f32.mrf.mxu1 }
  0xee   : > { %v533_v11 = vadd.f32 %v532_v10, %v363_v57  ;;  %v2486_v12 = vpop.f32.mrf.mxu0 }
  0xef   : > { %v2488_v13 = vpop.f32.mrf.mxu1 }
  0xf0   : > { %v721_v14 = vpop.f32.mrf.mxu0  ;;  %v781_v16 = vadd.f32 %v718_v9, %v533_v11 }
  0xf1   : > { %v535_v15 = vpop.f32.mrf.mxu1 }
  0xf2   : > { %v536_v17 = vadd.f32 %v535_v15, %v366_v61  ;;  %v2490_v18 = vpop.f32.mrf.mxu0  ;;  %v797_v23 = vmax.f32 %v781_v16, 0.0 }
  0xf3   : > { %v1940_v19 = vpop.f32.mrf.mxu1 }
  0xf4   : > { %v782_v20 = vadd.f32 %v721_v14, %v536_v17  ;;  %v2492_v21 = vpop.f32.mrf.mxu0 }
  0xf5   : > { %v2494_v22 = vpop.f32.mrf.mxu1 }
  0xf6   : > { %v798_v24 = vmax.f32 %v782_v20, 0.0  ;;  %v1959_v25 = vpop.f32.mrf.mxu0 }
  0xf7   : > { %v1941_v26 = vpop.f32.mrf.mxu1 }
  0xf8   : > { %v2496_v27 = vpack.c.bf16 %v798_v24, %v797_v23  ;;  %v2498_v28 = vpop.f32.mrf.mxu0 }
  0xf9   : > { %v551_v29 = vpop.f32.mrf.mxu1 }
  0xfa   : > { %v1962_v30 = vpop.f32.mrf.mxu0 }
  0xfb   : > { %v1944_v31 = vpop.f32.mrf.mxu1 }
  0xfc   : > { %v750_v32 = vpop.f32.mrf.mxu0  ;;  %v573_v57 = vadd.f32 %v1944_v31, %v2462_v56  ;;  %v560_v31 = vadd.f32 %v1941_v26, %v2474_v3 }
  0xfd   : > { %v564_v33 = vpop.f32.mrf.mxu1 }
  0xfe   : > { %v1963_v34 = vpop.f32.mrf.mxu0  ;;  %v791_v17 = vadd.f32 %v1962_v30, %v573_v57  ;;  %v565_v56 = vadd.f32 %v564_v33, %v2464_v58 }
  0xff   : > { %v1945_v35 = vpop.f32.mrf.mxu1 }
 0x100   : > { %v753_v36 = vpop.f32.mrf.mxu0  ;;  %v576_v50 = vadd.f32 %v1945_v35, %v1927_v60  ;;  %v807_v30 = vmax.f32 %v791_v17, 0.0 }
 0x101   : > { %v567_v37 = vpop.f32.mrf.mxu1 }
 0x102   : > { %v1966_v38 = vpop.f32.mrf.mxu0 }
 0x103   : > { %v1948_v39 = vpop.f32.mrf.mxu1 }
 0x104   : > { %v589_v40 = vadd.f32 %v1948_v39, %v1930_v0  ;;  %v766_v41 = vpop.f32.mrf.mxu0  ;;  %v789_v39 = vadd.f32 %v750_v32, %v565_v56 }
 0x105   : > { %v580_v42 = vpop.f32.mrf.mxu1 }
 0x106   : > { %v1967_v43 = vpop.f32.mrf.mxu0  ;;  %v795_v45 = vadd.f32 %v1966_v38, %v589_v40  ;;  %v581_v46 = vadd.f32 %v580_v42, %v411_v2  ;;  %v792_v2 = vadd.f32 %v1963_v34, %v576_v50  ;;  %v557_v38 = vadd.f32 %v1940_v19, %v2470_v63 }
 0x107   : > { %v1949_v44 = vpop.f32.mrf.mxu1  ;;  %v788_v40 = vadd.f32 %v1959_v25, %v560_v31  ;;  %v549_v63 = vadd.f32 %v2494_v22, %v2472_v1  ;;  %v805_v19 = vmax.f32 %v789_v39, 0.0  ;;  %v541_v1 = vadd.f32 %v2484_v8, %v2460_v55 }
 0x108   : > { %v592_v47 = vadd.f32 %v1949_v44, %v1931_v4  ;;  %v769_v48 = vpop.f32.mrf.mxu0  ;;  %v811_v9 = vmax.f32 %v795_v45, 0.0  ;;  %v793_v0 = vadd.f32 %v766_v41, %v581_v46  ;;  %v568_v4 = vadd.f32 %v567_v37, %v2468_v62 }
 0x109   : > { %v583_v49 = vpop.f32.mrf.mxu1  ;;  %v808_v34 = vmax.f32 %v792_v2, 0.0  ;;  %v552_v41 = vadd.f32 %v551_v29, %v2480_v5  ;;  %v544_v5 = vadd.f32 %v2488_v13, %v2466_v59  ;;  %v804_v25 = vmax.f32 %v788_v40, 0.0 }
 0x10a   : > { %v796_v51 = vadd.f32 %v1967_v43, %v592_v47  ;;  %v584_v52 = vadd.f32 %v583_v49, %v414_v6  ;;  %v2500_v53 = vpop.f32.mrf.mxu0  ;;  %v809_v20 = vmax.f32 %v793_v0, 0.0  ;;  %v790_v35 = vadd.f32 %v753_v36, %v568_v4 }
 0x10b   : > { %v2503_v61 = vpop.f32.mrf.mxu1  ;;  %v818_v42 = vpack.c.bf16 %v808_v34, %v807_v30  ;;  %v787_v36 = vadd.f32 %v2490_v18, %v557_v38  ;;  %v786_v29 = vadd.f32 %v2498_v28, %v552_v41  ;;  %v785_v22 = vadd.f32 %v2492_v21, %v549_v63 }
 0x10c   : > { %v812_v10 = vmax.f32 %v796_v51, 0.0  ;;  %v794_v11 = vadd.f32 %v769_v48, %v584_v52  ;;  %v2507_v15 = vpop.f32.mrf.mxu0  ;;  %v806_v3 = vmax.f32 %v790_v35, 0.0  ;;  %v784_v59 = vadd.f32 %v2486_v12, %v544_v5 }
 0x10d   : > { %v2505_v14 = vpop.f32.mrf.mxu1  ;;  %v803_v18 = vmax.f32 %v787_v36, 0.0  ;;  %v802_v48 = vmax.f32 %v786_v29, 0.0  ;;  %v783_v49 = vadd.f32 %v2482_v7, %v541_v1  ;;  %v801_v50 = vmax.f32 %v785_v22, 0.0 }
 0x10e   : > { %v820_v60 = vpack.c.bf16 %v812_v10, %v811_v9  ;;  %v810_v16 = vmax.f32 %v794_v11, 0.0  ;;  %v2513_v23 = vpop.f32.mrf.mxu0  ;;  %v817_v44 = vpack.c.bf16 %v806_v3, %v805_v19  ;;  %v800_v21 = vmax.f32 %v784_v59, 0.0 }
 0x10f   : > { %v2510_v6 = vpop.f32.mrf.mxu1  ;;  %v816_v13 = vpack.c.bf16 %v804_v25, %v803_v18  ;;  %v815_v51 = vpack.c.bf16 %v802_v48, %v801_v50  ;;  %v799_v57 = vmax.f32 %v783_v49, 0.0  ;;  %v1123_v4 = vadd.f32 %v2500_v53, %v2503_v61 }
 0x110   : > { %2043 = vmatpush3.bf16.msra.mxu1 %v820_v60  ;;  %v819_v62 = vpack.c.bf16 %v810_v16, %v809_v20  ;;  %v1117_v58 = vpop.f32.mrf.mxu0  ;;  %v1115_v17 = vadd.f32 %v2507_v15, %v2505_v14  ;;  %v1126_v56 = vadd.f32 %v2513_v23, %v2510_v6  ;;  %v2257_v34 = vmov 1065369472  }
 0x111   : > { %v2515_v24 = vpop.f32.mrf.mxu1  ;;  %2044 = vmatprep.subr.bf16.mxu1 %v2255_v54  ;;  %v814_v0 = vpack.c.bf16 %v800_v21, %v799_v57 }
 0x112   : > { %v2531_v32 = vpop.f32.mrf.mxu0  ;;  %v1118_v35 = vadd.f32 %v1117_v58, %v2515_v24 }
 0x113   : > { %v2519_v37 = vpop.f32.mrf.mxu1 }
 0x114   : > { %2045 = vmatpush3.bf16.msra.mxu1 %v819_v62  ;;  %v1130_v46 = vpop.f32.mrf.mxu0 }
 0x115   : > { %v2522_v33 = vpop.f32.mrf.mxu1  ;;  %2046 = vmatprep.subr.bf16.mxu1 %v2255_v54 }
 0x116   : > { %v2551_v55 = vpop.f32.mrf.mxu0 }
 0x117   : > { %v2526_v26 = vpop.f32.mrf.mxu1 }
 0x118   : > { %2047 = vmatpush3.bf16.msra.mxu1 %v818_v42  ;;  %v1133_v12 = vpop.f32.mrf.mxu0  ;;  %v1131_v42 = vadd.f32 %v1130_v46, %v2522_v33 }
 0x119   : > { %v2533_v43 = vpop.f32.mrf.mxu1  ;;  %2048 = vmatprep.subr.bf16.mxu1 %v2255_v54 }
 0x11a   : > { %v1998_v7 = vpop.f32.mrf.mxu0  ;;  %v1134_v24 = vadd.f32 %v1133_v12, %v2533_v43 }
 0x11b   : > { %v2539_v45 = vpop.f32.mrf.mxu1 }
 0x11c   : > { %2049 = vmatpush3.bf16.msra.mxu1 %v817_v44  ;;  %v2561_v60 = vpop.f32.mrf.mxu0 }
 0x11d   : > { %v2544_v47 = vpop.f32.mrf.mxu1  ;;  %2050 = vmatprep.subr.bf16.mxu1 %v2255_v54 }
 0x11e   : > { %v1999_v61 = vpop.f32.mrf.mxu0 }
 0x11f   : > { %v2548_v28 = vpop.f32.mrf.mxu1 }
 0x120   : > { %2051 = vmatpush3.bf16.msra.mxu1 %v816_v13  ;;  %v1149_v6 = vpop.f32.mrf.mxu0 }
 0x121   : > { %v2553_v8 = vpop.f32.mrf.mxu1  ;;  %2052 = vmatprep.subr.bf16.mxu1 %v2255_v54 }
 0x122   : > { %v2002_v63 = vpop.f32.mrf.mxu0 }
 0x123   : > { %v1984_v52 = vpop.f32.mrf.mxu1 }
 0x124   : > { %2053 = vmatpush3.bf16.msra.mxu1 %v815_v51  ;;  %v1162_v1 = vpop.f32.mrf.mxu0  ;;  %v1171_v33 = vadd.f32 %v2002_v63, %v1984_v52 }
 0x125   : > { %v1001_v9 = vpop.f32.mrf.mxu1  ;;  %2054 = vmatprep.subr.bf16.mxu1 %v2255_v54 }
 0x126   : > { %v2003_v13 = vpop.f32.mrf.mxu0  ;;  %v1163_v57 = vadd.f32 %v1162_v1, %v1001_v9 }
 0x127   : > { %v1985_v10 = vpop.f32.mrf.mxu1 }
 0x128   : > { %2055 = vmatpush3.bf16.msra.mxu1 %v814_v0  ;;  %v1165_v46 = vpop.f32.mrf.mxu0  ;;  %v1174_v21 = vadd.f32 %v2003_v13, %v1985_v10 }
 0x129   : > { %v1004_v11 = vpop.f32.mrf.mxu1  ;;  %2056 = vmatprep.subr.bf16.mxu1 %v2255_v54 }
 0x12a   : > { %v1166_v12 = vadd.f32 %v1165_v46, %v1004_v11 }
 0x12b   : > { %v2008_v2 = vpop.f32.mrf.mxu1 }
 0x12c   : > { %2057 = vmatpush3.bf16.msra.mxu1 %v2496_v27  ;;  %v1357_v20 = vadd.f32 %v2008_v2, %v1123_v4  ;;  %v1158_v2 = vadd.f32 %v1999_v61, %v2548_v28  ;;  %v1147_v28 = vadd.f32 %v2561_v60, %v2544_v47 }
 0x12d   : > { %v1292_v16 = vpop.f32.mrf.mxu1 }
 0x12e   : > { %v1355_v62 = vadd.f32 %v1292_v16, %v1115_v17  ;;  %v1373_v38 = vmax.f32 %v1357_v20, 0.0 }
 0x12f   : > { %v2009_v31 = vpop.f32.mrf.mxu1  ;;  %2059 = vmatmul.mubr.bf16.vlgmr.msra.gmra.mxu1 %v2257_v34 }
 0x130   : > { %v1358_v53 = vadd.f32 %v2009_v31, %v1126_v56  ;;  %v1371_v41 = vmax.f32 %v1355_v62, 0.0  ;;  %v1155_v31 = vadd.f32 %v1998_v7, %v2539_v45 }
 0x131   : > { %v1295_v27 = vpop.f32.mrf.mxu1 }
 0x132   : > { %v1374_v30 = vmax.f32 %v1358_v53, 0.0  ;;  %v1356_v39 = vadd.f32 %v1295_v27, %v1118_v35  ;;  %v1150_v53 = vadd.f32 %v1149_v6, %v2553_v8  ;;  %v1139_v8 = vadd.f32 %v2531_v32, %v2519_v37  ;;  %v2185_v37 = vld [vmem:[%s2679_s2 + $0x38] sm:$0xff]   ;;  %v2186_v32 = vld [vmem:[%s2679_s2 + $0x30] sm:$0xff]  }
 0x133   : > { %v2012_v40 = vpop.f32.mrf.mxu1 }
 0x134   : > { %v2569_v14 = vpack.c.bf16 %v1374_v30, %v1373_v38  ;;  %v1372_v15 = vmax.f32 %v1356_v39, 0.0  ;;  %v1142_v38 = vadd.f32 %v2551_v55, %v2526_v26  ;;  %v2187_v55 = vld [vmem:[%s2679_s2 + $0x28] sm:$0xff]  }
 0x135   : > { %v1308_v23 = vpop.f32.mrf.mxu1 }
 0x136   : > { %v2572_v3 = vpack.c.bf16 %v1372_v15, %v1371_v41  ;;  %v1359_v58 = vadd.f32 %v1308_v23, %v1131_v42  ;;  %v1361_v15 = vadd.f32 %v2012_v40, %v1139_v8  ;;  %v2189_v40 = vld [vmem:[%s2679_s2 + $0x18] sm:$0xff]   ;;  %v2191_v42 = vld [vmem:[%s2679_s2 + $0x8] sm:$0xff]  }
 0x137   : > { %v2013_v36 = vpop.f32.mrf.mxu1 }
 0x138   : > { %v1375_v29 = vmax.f32 %v1359_v58, 0.0  ;;  %v1362_v30 = vadd.f32 %v2013_v36, %v1142_v38  ;;  %v1377_v23 = vmax.f32 %v1361_v15, 0.0 }
 0x139   : > { %v1311_v19 = vpop.f32.mrf.mxu1 }
 0x13a   : > { %v1360_v5 = vadd.f32 %v1311_v19, %v1134_v24  ;;  %v1378_v47 = vmax.f32 %v1362_v30, 0.0 }
 0x13b   : > { %v2016_v25 = vpop.f32.mrf.mxu1 }
 0x13c   : > { %v1376_v44 = vmax.f32 %v1360_v5, 0.0  ;;  %v1365_v10 = vadd.f32 %v2016_v25, %v1155_v31  ;;  %v1390_v26 = vpack.c.bf16 %v1378_v47, %v1377_v23 }
 0x13d   : > { %v1324_v18 = vpop.f32.mrf.mxu1 }
 0x13e   : > { %v1389_v22 = vpack.c.bf16 %v1376_v44, %v1375_v29  ;;  %v1381_v45 = vmax.f32 %v1365_v10, 0.0  ;;  %v1363_v7 = vadd.f32 %v1324_v18, %v1147_v28 }
 0x13f   : > { %v2017_v59 = vpop.f32.mrf.mxu1 }
 0x140   : > { %v1366_v35 = vadd.f32 %v2017_v59, %v1158_v2  ;;  %v1379_v6 = vmax.f32 %v1363_v7, 0.0 }
 0x141   : > { %v1327_v48 = vpop.f32.mrf.mxu1 }
 0x142   : > { %v1382_v9 = vmax.f32 %v1366_v35, 0.0  ;;  %v1364_v11 = vadd.f32 %v1327_v48, %v1150_v53 }
 0x143   : > { %v2020_v49 = vpop.f32.mrf.mxu1 }
 0x144   : > { %v1369_v51 = vadd.f32 %v2020_v49, %v1171_v33  ;;  %v1392_v39 = vpack.c.bf16 %v1382_v9, %v1381_v45  ;;  %v1380_v41 = vmax.f32 %v1364_v11, 0.0 }
 0x145   : > { %v1340_v50 = vpop.f32.mrf.mxu1 }
 0x146   : > { %v1385_v16 = vmax.f32 %v1369_v51, 0.0  ;;  %v1367_v17 = vadd.f32 %v1340_v50, %v1163_v57  ;;  %v1391_v60 = vpack.c.bf16 %v1380_v41, %v1379_v6 }
 0x147   : > { %v2021_v43 = vpop.f32.mrf.mxu1 }
 0x148   : > { %v1370_v0 = vadd.f32 %v2021_v43, %v1174_v21  ;;  %v1383_v27 = vmax.f32 %v1367_v17, 0.0 }
 0x149   : > { %v1343_v4 = vpop.f32.mrf.mxu1 }
 0x14a   : > { %v1386_v56 = vmax.f32 %v1370_v0, 0.0  ;;  %v1368_v20 = vadd.f32 %v1343_v4, %v1166_v12 }
 0x14c   : > { %v1394_v62 = vpack.c.bf16 %v1386_v56, %v1385_v16  ;;  %v1384_v52 = vmax.f32 %v1368_v20, 0.0 }
 0x14e   : > { %2023 = vmatpush3.bf16.msra.mxu0 %v1394_v62  ;;  %v1393_v61 = vpack.c.bf16 %v1384_v52, %v1383_v27 }
 0x14f   : > { %2024 = vmatprep.subr.bf16.mxu0 %v2255_v54 }
 0x152   : > { %2025 = vmatpush3.bf16.msra.mxu0 %v1393_v61 }
 0x153   : > { %2026 = vmatprep.subr.bf16.mxu0 %v2255_v54 }
 0x156   : > { %2027 = vmatpush3.bf16.msra.mxu0 %v1392_v39 }
 0x157   : > { %2028 = vmatprep.subr.bf16.mxu0 %v2255_v54 }
 0x15a   : > { %2029 = vmatpush3.bf16.msra.mxu0 %v1391_v60 }
 0x15b   : > { %2030 = vmatprep.subr.bf16.mxu0 %v2255_v54 }
 0x15e   : > { %2031 = vmatpush3.bf16.msra.mxu0 %v1390_v26 }
 0x15f   : > { %2032 = vmatprep.subr.bf16.mxu0 %v2255_v54 }
 0x162   : > { %2033 = vmatpush3.bf16.msra.mxu0 %v1389_v22 }
 0x163   : > { %2034 = vmatprep.subr.bf16.mxu0 %v2255_v54 }
 0x166   : > { %2035 = vmatpush3.bf16.msra.mxu0 %v2569_v14  ;;  %v2190_v14 = vld [vmem:[%s2679_s2 + $0x10] sm:$0xff]  }
 0x167   : > { %2036 = vmatprep.subr.bf16.mxu0 %v2255_v54 }
 0x16a   : > { %2037 = vmatpush3.bf16.msra.mxu0 %v2572_v3  ;;  %v2192_v3 = vld [vmem:[%s2679_s2] sm:$0xff]  }
 0x16b   : > { %2062 = vmatprep.subr.bf16.mxu0 %v2255_v54 }
 0x16d   : > { %2039 = vmatmul.mubr.bf16.vlgmr.msra.gmra.mxu0 %v2257_v34  ;;  %v2188_v34 = vld [vmem:[%s2679_s2 + $0x20] sm:$0xff]  }
 0x16e   : > { %2063 = vmatpush3.bf16.msra.mxu0 %v2185_v37  ;;  %2078 = vmatprep.mubr.msk.bf16.mxu0 %vm2256_vm2, %v2255_v54 }
 0x16f   : > { %2064 = vmatprep.subr.bf16.mxu0 %v2255_v54 }
 0x172   : > { %2065 = vmatpush3.bf16.msra.mxu0 %v2186_v32 }
 0x173   : > { %2066 = vmatprep.subr.bf16.mxu0 %v2255_v54 }
 0x176   : > { %2067 = vmatpush3.bf16.msra.mxu0 %v2187_v55 }
 0x177   : > { %2068 = vmatprep.subr.bf16.mxu0 %v2255_v54 }
 0x17a   : > { %2069 = vmatpush3.bf16.msra.mxu0 %v2188_v34 }
 0x17b   : > { %2070 = vmatprep.subr.bf16.mxu0 %v2255_v54 }
 0x17e   : > { %2071 = vmatpush3.bf16.msra.mxu0 %v2189_v40 }
 0x17f   : > { %2072 = vmatprep.subr.bf16.mxu0 %v2255_v54 }
 0x182   : > { %2073 = vmatpush3.bf16.msra.mxu0 %v2190_v14 }
 0x183   : > { %2074 = vmatprep.subr.bf16.mxu0 %v2255_v54 }
 0x186   : > { %2075 = vmatpush3.bf16.msra.mxu0 %v2191_v42 }
 0x187   : > { %2076 = vmatprep.subr.bf16.mxu0 %v2255_v54  ;;  %v221_v54 = vld [vmem:[%s2680_s3] sm:$0x1] }
 0x18a   : > { %2077 = vmatpush3.bf16.msra.mxu0 %v2192_v3 }
 0x1ef   : > { %v1469_v36 = vpop.f32.mrf.mxu1 }
 0x1f1   : > { %v2060_v24 = vpop.f32.mrf.mxu1 }
 0x1f3   : > { %v1472_v58 = vpop.f32.mrf.mxu1 }
 0x1f5   : > { %v2061_v63 = vpop.f32.mrf.mxu1 }
 0x22d   : > { %v1429_v19 = vpop.f32.mrf.mxu0 }
 0x22e   : > { %v1470_v5 = vadd.f32 %v1469_v36, %v1429_v19 }
 0x22f   : > { %v2040_v25 = vpop.f32.mrf.mxu0 }
 0x230   : > { %v1475_v29 = vmul.f32 0.00390625, %v1470_v5 }
 0x231   : > { %v1432_v44 = vpop.f32.mrf.mxu0 }
 0x232   : > { %v1476_v1 = vpack.c.bf16 %v1475_v29, %v1475_v29 }
 0x233   : > { %v2041_v18 = vpop.f32.mrf.mxu0 }
 0x234   : > { %2079 = vmatmul.mubr.bf16.vlgmr.msra.gmra.mxu0 %v1476_v1 }
 0x2f4   : > { %v1559_v22 = vpop.f32.mrf.mxu0 }
 0x2f5   : > { %v1560_v59 = vadd.f32 %v1559_v22, %v221_v54 }
 0x2f6   : > { %v2080_v13 = vpop.f32.mrf.mxu0 }
 0x2f7   : > { %1565 = vst [vmem:[%s189_s20] sm:$0x1] %v1560_v59 }
 0x2f8   : > { %v1562_v48 = vpop.f32.mrf.mxu0 }
 0x2f9   : > { %2206 = shalt.err (!%p2203_p3)
}
 0x2fa   : > { %s2207_s7 = scalar_lea.hbm %s2636_s28, 16  ;;  %s2211_s10 = scalar_lea.hbm %s2681_s4, 32 }
 0x2fb   : > { %p2208_p4 = scmp.ne.s32.totalorder %s2636_s28, %s2207_s7  ;;  %p2212_p9 = scmp.lt.s32.totalorder %s2636_s28, %s2681_s4 }
 0x2fc   : > { %p2213_p10 = scmp.lt.s32.totalorder %s2211_s10, %s2207_s7 }
 0x2fd   : > { %p2209_p7 = pnand %p2208_p4, %p2322_p5 }
 0x2fe   : > { %p2214_p11 = por %p2213_p10, %p2212_p9 }
 0x2ff   : > { %p2210_p8 = pneg %p2209_p7 }
 0x301   : > { %p2215_p12 = pnand %p2214_p11, %p2210_p8 }
 0x303   : > { %2218 = shalt.err (!%p2215_p12)
}
 0x304   : > { %2092 = dma.vmem_to_hbm [thread:$0]  (%p2322_p5), %s2638_s22, 16, %s2636_s28, %s1567_s29   ;;  %v2081_v49 = vpop.f32.mrf.mxu0 }
 0x305 PF: > { %p2098_p13 = scmp.ge.s32.totalorder %s2253_s18, 2  ;;  %s1591_s13 = sand.u32 1, %s2241_s15  }
 0x306   : > { %s1592_s14 = scalar_lea.sflag [#allocation3], %s1591_s13 }
 0x307   : > { %p2095_p0 = pnand %p2098_p13, %p2326_p6 }
 0x309   : > { %p2096_p1 = pneg %p2095_p0 }
 0x30b   : > { %2236 = dma.done.wait (%p2096_p1), %s1592_s14, 16  }
 0x30c   : > { %2238 = vsyncadd (%p2096_p1), %s1592_s14, 4294967280  ;;  %p14_p2 = scmp.ge.s32.totalorder %s2309_s21, 4   ;;  %s2684_s15 = smov %s2245_s16 }
 0x30d   : > { %s2685_s16 = smov %s2249_s17  ;;  %s2686_s17 = smov %s2320_s24 }
 0x30e   : > { %s2687_s18 = smov %s2309_s21  ;;  %16 = sbr.rel (!%p14_p2) target bundleno = 3 (0x3), region = 78 }
 0x313   :  { %1596 = vsyncpa [#allocation3], 1 }
 0x314   :  { %1598 = vsyncpa [#allocation3 + $0x1], 1 }

</bundles_post_ra>
